<compile_context>
chip_gen: v7x
topology: tpu7x:2x2x1
jax: 0.10.0
libtpu: 0.0.40
codegen_flags: <defaults>
</compile_context>

<pallas_src>
import jax
import jax.numpy as jnp
from jax.experimental import pallas as pl
from jax.experimental.pallas import tpu as pltpu

STATE_DIM = 3      # Pendulum-v1 observation_space.shape[0]
ACTION_DIM = 1     # Pendulum-v1 action_space.shape[0]
H1 = 400
H2 = 300
LN_EPS = 1e-5


def _round_up(x, m):
    return (x + m - 1) // m * m


def _critic_kernel(state_ref, action_ref,
                   w1_ref, b1_ref, g_ref, beta_ref,
                   w2a_ref, w2b_ref, b2_ref,
                   w3_ref, b3_ref,
                   out_ref):
    state = state_ref[...]                       # (TB, STATE_DIM) f32
    action = action_ref[...]                     # (TB, ACTION_DIM) f32

    # ---- layer1 + ReLU: K=3 contraction as unrolled VPU broadcast FMAs ----
    h1 = state[:, 0:1] * w1_ref[0:1, :]
    for d in range(1, STATE_DIM):
        h1 = h1 + state[:, d:d + 1] * w1_ref[d:d + 1, :]
    h1 = jnp.maximum(h1 + b1_ref[...], 0.0)

    # ---- LayerNorm(400): biased variance, eps inside rsqrt, affine --------
    mean = jnp.mean(h1, axis=-1, keepdims=True)
    cent = h1 - mean
    var = jnp.mean(cent * cent, axis=-1, keepdims=True)
    h1 = cent * jax.lax.rsqrt(var + LN_EPS)
    h1 = h1 * g_ref[...] + beta_ref[...]

    # ---- layer2 + ReLU:  cat(h1, action) @ W2^T == h1 @ W2a + action @ W2b
    # h1 @ W2a is the only real matmul -> MXU (bf16 operands, f32 accum).
    # The K=1 action term is a broadcast outer product on the VPU.
    h2 = jnp.dot(h1.astype(w2a_ref.dtype), w2a_ref[...],
                 preferred_element_type=jnp.float32)
    for d in range(ACTION_DIM):
        h2 = h2 + action[:, d:d + 1] * w2b_ref[d:d + 1, :]
    h2 = jnp.maximum(h2 + b2_ref[...], 0.0)

    # ---- layer3: N=1 -> VPU multiply + XLU lane-reduce; b3 from SMEM ------
    q = jnp.sum(h2 * w3_ref[...], axis=-1, keepdims=True) + b3_ref[0, 0]
    out_ref[...] = q.astype(out_ref.dtype)


def critic_forward(state, action, params, *, block_b=512):
    """state: (B, 3) f32, action: (B, 1) f32 -> Q: (B, 1) f32."""
    B = state.shape[0]
    state = state.astype(jnp.float32)
    action = action.astype(jnp.float32)

    # Batch tile: multiple of 8 sublanes, capped so (TB, 512)/(TB, 384) f32
    # intermediates stay far inside VMEM on every generation (incl. v7x 64MiB).
    tb = min(int(block_b), _round_up(B, 8))
    bp = _round_up(B, tb)
    if bp != B:                                   # pad ragged last batch block
        state = jnp.pad(state, ((0, bp - B), (0, 0)))
        action = jnp.pad(action, ((0, bp - B), (0, 0)))

    def batch_spec(cols):
        return pl.BlockSpec((tb, cols), lambda i: (i, 0))

    def const_spec(shape):
        return pl.BlockSpec(shape, lambda i: (0, 0))   # VMEM-resident weights

    out = pl.pallas_call(
        _critic_kernel,
        out_shape=jax.ShapeDtypeStruct((bp, 1), jnp.float32),
        grid=(bp // tb,),
        in_specs=[
            batch_spec(STATE_DIM),                          # state
            batch_spec(ACTION_DIM),                         # action
            const_spec((STATE_DIM, H1)),                    # w1
            const_spec((1, H1)),                            # b1
            const_spec((1, H1)),                            # LN gamma
            const_spec((1, H1)),                            # LN beta
            const_spec((H1, H2)),                           # w2a (bf16, MXU)
            const_spec((ACTION_DIM, H2)),                   # w2b
            const_spec((1, H2)),                            # b2
            const_spec((1, H2)),                            # w3 (lane-dense row)
            pl.BlockSpec(memory_space=pltpu.MemorySpace.SMEM),  # b3 scalar
        ],
        out_specs=batch_spec(1),
        compiler_params=pltpu.CompilerParams(
            dimension_semantics=("parallel",),
        ),
    )(state, action,
      params["w1"], params["b1"], params["ln_g"], params["ln_b"],
      params["w2a"], params["w2b"], params["b2"],
      params["w3"], params["b3"])
    return out[:B]


def init_params(key, matmul_dtype=jnp.bfloat16):
    """Deterministic synthetic parameters (PyTorch init ranges, feature-major)."""
    ks = jax.random.split(key, 6)

    def unif(k, shape, fan_in):
        bound = 1.0 / jnp.sqrt(jnp.float32(fan_in))
        return jax.random.uniform(k, shape, jnp.float32, -bound, bound)

    # layer1: Linear(3, 400)   stored as (3, 400)
    w1 = unif(ks[0], (STATE_DIM, H1), STATE_DIM)
    b1 = unif(ks[1], (1, H1), STATE_DIM)
    # LayerNorm(400)
    ln_g = jnp.ones((1, H1), jnp.float32)
    ln_b = jnp.zeros((1, H1), jnp.float32)
    # layer2: Linear(401, 300) stored as (400, 300) [bf16 MXU operand] + (1, 300)
    w2 = unif(ks[2], (H1 + ACTION_DIM, H2), H1 + ACTION_DIM)
    w2a = w2[:H1, :].astype(matmul_dtype)
    w2b = w2[H1:, :]
    b2 = unif(ks[3], (1, H2), H1 + ACTION_DIM)
    # layer3: Linear(300, 1)   stored lane-dense as (1, 300); bias as (1, 1)
    w3 = unif(ks[4], (1, H2), H2)
    b3 = unif(ks[5], (1, 1), H2)
    return dict(w1=w1, b1=b1, ln_g=ln_g, ln_b=ln_b,
                w2a=w2a, w2b=w2b, b2=b2, w3=w3, b3=b3)


def critic_reference(state, action, p):
    """Pure-JAX reference using the kernel's dtypes (bf16 MXU operands)."""
    h1 = jnp.maximum(state @ p["w1"] + p["b1"], 0.0)
    mean = jnp.mean(h1, axis=-1, keepdims=True)
    var = jnp.mean((h1 - mean) ** 2, axis=-1, keepdims=True)
    h1 = (h1 - mean) / jnp.sqrt(var + LN_EPS) * p["ln_g"] + p["ln_b"]
    h2 = jnp.dot(h1.astype(p["w2a"].dtype), p["w2a"],
                 preferred_element_type=jnp.float32)
    h2 = jnp.maximum(h2 + action @ p["w2b"] + p["b2"], 0.0)
    return jnp.sum(h2 * p["w3"], axis=-1, keepdims=True) + p["b3"]


def critic_reference_f32(state, action, p):
    """Exact f32 forward matching the PyTorch module semantics."""
    w2a = p["w2a"].astype(jnp.float32)
    h1 = jnp.maximum(state @ p["w1"] + p["b1"], 0.0)
    mean = jnp.mean(h1, axis=-1, keepdims=True)
    var = jnp.mean((h1 - mean) ** 2, axis=-1, keepdims=True)
    h1 = (h1 - mean) / jnp.sqrt(var + LN_EPS) * p["ln_g"] + p["ln_b"]
    h2 = jnp.maximum(h1 @ w2a + action @ p["w2b"] + p["b2"], 0.0)
    return jnp.sum(h2 * p["w3"], axis=-1, keepdims=True) + p["b3"]


if __name__ == "__main__":
    key = jax.random.PRNGKey(0)
    kp, ks, ka = jax.random.split(key, 3)

    B = 8
    params = init_params(kp)
    state = jax.random.normal(ks, (B, STATE_DIM), jnp.float32)
    action = jax.random.uniform(ka, (B, ACTION_DIM), jnp.float32,
                                minval=-2.0, maxval=2.0)

    q = jax.block_until_ready(critic_forward(state, action, params))
    assert q.shape == (B, 1)

    # Tight check vs. a reference that uses the same (bf16-MXU) dtypes.
    q_ref = critic_reference(state, action, params)
    assert jnp.allclose(q, q_ref, atol=1e-3, rtol=1e-3), (q, q_ref)
    # Loose check vs. the exact f32 PyTorch-semantics forward (bf16 matmul
    # introduces ~1e-3 relative error on Q).
    q_f32 = critic_reference_f32(state, action, params)
    assert jnp.allclose(q, q_f32, atol=2e-2, rtol=2e-2), (q, q_f32)

    # Also exercise a batch that is not a multiple of the batch tile
    # (covers the padded last grid block).
    B2 = 20
    s2 = jax.random.normal(jax.random.PRNGKey(1), (B2, STATE_DIM), jnp.float32)
    a2 = jax.random.uniform(jax.random.PRNGKey(2), (B2, ACTION_DIM),
                            jnp.float32, minval=-2.0, maxval=2.0)
    q2 = jax.block_until_ready(critic_forward(s2, a2, params))
    assert q2.shape == (B2, 1)
    assert jnp.allclose(q2, critic_reference(s2, a2, params),
                        atol=1e-3, rtol=1e-3)

    print("KERNEL_OK")
</pallas_src>

<mosaic_0001>
module attributes {stable_mosaic.version = 11 : i64} {
  func.func @_critic_kernel(%arg0: i32, %arg1: memref<8x3xf32, #tpu.memory_space<vmem>>, %arg2: memref<8x1xf32, #tpu.memory_space<vmem>>, %arg3: memref<3x400xf32, #tpu.memory_space<vmem>>, %arg4: memref<1x400xf32, #tpu.memory_space<vmem>>, %arg5: memref<1x400xf32, #tpu.memory_space<vmem>>, %arg6: memref<1x400xf32, #tpu.memory_space<vmem>>, %arg7: memref<400x300xbf16, #tpu.memory_space<vmem>>, %arg8: memref<1x300xf32, #tpu.memory_space<vmem>>, %arg9: memref<1x300xf32, #tpu.memory_space<vmem>>, %arg10: memref<1x300xf32, #tpu.memory_space<vmem>>, %arg11: memref<1x1xf32, #tpu.memory_space<smem>>, %arg12: memref<8x1xf32, #tpu.memory_space<vmem>>) attributes {dimension_semantics = [#tpu.dimension_semantics<parallel>], iteration_bounds = array<i64: 1>, scalar_prefetch = 0 : i64, scratch_operands = 0 : i64, tpu.core_type = #tpu.core_type<tc>, window_params = [{transform_indices = @transform_0, window_bounds = array<i64: 8, 3>}, {transform_indices = @transform_1, window_bounds = array<i64: 8, 1>}, {pipeline_mode = #tpu.pipeline_mode<synchronous>, transform_indices = @transform_2, window_bounds = array<i64: 3, 400>}, {pipeline_mode = #tpu.pipeline_mode<synchronous>, transform_indices = @transform_3, window_bounds = array<i64: 1, 400>}, {pipeline_mode = #tpu.pipeline_mode<synchronous>, transform_indices = @transform_4, window_bounds = array<i64: 1, 400>}, {pipeline_mode = #tpu.pipeline_mode<synchronous>, transform_indices = @transform_5, window_bounds = array<i64: 1, 400>}, {pipeline_mode = #tpu.pipeline_mode<synchronous>, transform_indices = @transform_6, window_bounds = array<i64: 400, 300>}, {pipeline_mode = #tpu.pipeline_mode<synchronous>, transform_indices = @transform_7, window_bounds = array<i64: 1, 300>}, {pipeline_mode = #tpu.pipeline_mode<synchronous>, transform_indices = @transform_8, window_bounds = array<i64: 1, 300>}, {pipeline_mode = #tpu.pipeline_mode<synchronous>, transform_indices = @transform_9, window_bounds = array<i64: 1, 300>}, {transform_indices = @transform_10, window_bounds = array<i64: 1, 1>}, {transform_indices = @transform_11, window_bounds = array<i64: 8, 1>}]} {
    %c0 = arith.constant 0 : index
    %c0_0 = arith.constant 0 : index
    %0 = vector.load %arg1[%c0, %c0_0] : memref<8x3xf32, #tpu.memory_space<vmem>>, vector<8x3xf32>
    %c0_1 = arith.constant 0 : index
    %c0_2 = arith.constant 0 : index
    %1 = vector.load %arg2[%c0_1, %c0_2] : memref<8x1xf32, #tpu.memory_space<vmem>>, vector<8x1xf32>
    %2 = vector.extract_strided_slice %0 {offsets = [0, 0], sizes = [8, 1], strides = [1, 1]} : vector<8x3xf32> to vector<8x1xf32>
    %c0_3 = arith.constant 0 : index
    %c0_4 = arith.constant 0 : index
    %3 = vector.load %arg3[%c0_3, %c0_4] : memref<3x400xf32, #tpu.memory_space<vmem>>, vector<1x400xf32>
    %4 = vector.broadcast %2 : vector<8x1xf32> to vector<8x400xf32>
    %5 = vector.broadcast %3 : vector<1x400xf32> to vector<8x400xf32>
    %6 = arith.mulf %4, %5 : vector<8x400xf32>
    %7 = vector.extract_strided_slice %0 {offsets = [0, 1], sizes = [8, 1], strides = [1, 1]} : vector<8x3xf32> to vector<8x1xf32>
    %c1 = arith.constant 1 : index
    %c0_5 = arith.constant 0 : index
    %8 = vector.load %arg3[%c1, %c0_5] : memref<3x400xf32, #tpu.memory_space<vmem>>, vector<1x400xf32>
    %9 = vector.broadcast %7 : vector<8x1xf32> to vector<8x400xf32>
    %10 = vector.broadcast %8 : vector<1x400xf32> to vector<8x400xf32>
    %11 = arith.mulf %9, %10 : vector<8x400xf32>
    %12 = arith.addf %6, %11 : vector<8x400xf32>
    %13 = vector.extract_strided_slice %0 {offsets = [0, 2], sizes = [8, 1], strides = [1, 1]} : vector<8x3xf32> to vector<8x1xf32>
    %c2 = arith.constant 2 : index
    %c0_6 = arith.constant 0 : index
    %14 = vector.load %arg3[%c2, %c0_6] : memref<3x400xf32, #tpu.memory_space<vmem>>, vector<1x400xf32>
    %15 = vector.broadcast %13 : vector<8x1xf32> to vector<8x400xf32>
    %16 = vector.broadcast %14 : vector<1x400xf32> to vector<8x400xf32>
    %17 = arith.mulf %15, %16 : vector<8x400xf32>
    %18 = arith.addf %12, %17 : vector<8x400xf32>
    %c0_7 = arith.constant 0 : index
    %c0_8 = arith.constant 0 : index
    %19 = vector.load %arg4[%c0_7, %c0_8] : memref<1x400xf32, #tpu.memory_space<vmem>>, vector<1x400xf32>
    %20 = vector.broadcast %19 : vector<1x400xf32> to vector<8x400xf32>
    %21 = arith.addf %18, %20 : vector<8x400xf32>
    %cst = arith.constant 0.000000e+00 : f32
    %22 = vector.broadcast %cst : f32 to vector<8x400xf32>
    %23 = arith.maximumf %21, %22 : vector<8x400xf32>
    %cst_9 = arith.constant dense<0.000000e+00> : vector<8xf32>
    %24 = vector.multi_reduction <add>, %23, %cst_9 [1] : vector<8x400xf32> to vector<8xf32>
    %25 = vector.shape_cast %24 : vector<8xf32> to vector<8x1xf32>
    %cst_10 = arith.constant 4.000000e+02 : f32
    %26 = vector.broadcast %cst_10 : f32 to vector<8x1xf32>
    %27 = arith.divf %25, %26 : vector<8x1xf32>
    %28 = vector.broadcast %27 : vector<8x1xf32> to vector<8x400xf32>
    %29 = arith.subf %23, %28 : vector<8x400xf32>
    %30 = arith.mulf %29, %29 : vector<8x400xf32>
    %cst_11 = arith.constant dense<0.000000e+00> : vector<8xf32>
    %31 = vector.multi_reduction <add>, %30, %cst_11 [1] : vector<8x400xf32> to vector<8xf32>
    %32 = vector.shape_cast %31 : vector<8xf32> to vector<8x1xf32>
    %cst_12 = arith.constant 4.000000e+02 : f32
    %33 = vector.broadcast %cst_12 : f32 to vector<8x1xf32>
    %34 = arith.divf %32, %33 : vector<8x1xf32>
    %cst_13 = arith.constant 9.99999974E-6 : f32
    %35 = vector.broadcast %cst_13 : f32 to vector<8x1xf32>
    %36 = arith.addf %34, %35 : vector<8x1xf32>
    %37 = math.rsqrt %36 : vector<8x1xf32>
    %38 = vector.broadcast %37 : vector<8x1xf32> to vector<8x400xf32>
    %39 = arith.mulf %29, %38 : vector<8x400xf32>
    %c0_14 = arith.constant 0 : index
    %c0_15 = arith.constant 0 : index
    %40 = vector.load %arg5[%c0_14, %c0_15] : memref<1x400xf32, #tpu.memory_space<vmem>>, vector<1x400xf32>
    %41 = vector.broadcast %40 : vector<1x400xf32> to vector<8x400xf32>
    %42 = arith.mulf %39, %41 : vector<8x400xf32>
    %c0_16 = arith.constant 0 : index
    %c0_17 = arith.constant 0 : index
    %43 = vector.load %arg6[%c0_16, %c0_17] : memref<1x400xf32, #tpu.memory_space<vmem>>, vector<1x400xf32>
    %44 = vector.broadcast %43 : vector<1x400xf32> to vector<8x400xf32>
    %45 = arith.addf %42, %44 : vector<8x400xf32>
    %46 = arith.truncf %45 : vector<8x400xf32> to vector<8x400xbf16>
    %c0_18 = arith.constant 0 : index
    %c0_19 = arith.constant 0 : index
    %47 = vector.load %arg7[%c0_18, %c0_19] : memref<400x300xbf16, #tpu.memory_space<vmem>>, vector<400x300xbf16>
    %cst_20 = arith.constant dense<0.000000e+00> : vector<8x300xf32>
    %48 = tpu.matmul %46, %47, %cst_20 {dimension_numbers = #tpu.dot_dimension_numbers<[1], [0], [0], [1], [0, 0, 1, 1], [], []>} : vector<8x400xbf16>, vector<400x300xbf16>, vector<8x300xf32> -> vector<8x300xf32>
    %c0_21 = arith.constant 0 : index
    %c0_22 = arith.constant 0 : index
    %49 = vector.load %arg8[%c0_21, %c0_22] : memref<1x300xf32, #tpu.memory_space<vmem>>, vector<1x300xf32>
    %50 = vector.broadcast %1 : vector<8x1xf32> to vector<8x300xf32>
    %51 = vector.broadcast %49 : vector<1x300xf32> to vector<8x300xf32>
    %52 = arith.mulf %50, %51 : vector<8x300xf32>
    %53 = arith.addf %48, %52 : vector<8x300xf32>
    %c0_23 = arith.constant 0 : index
    %c0_24 = arith.constant 0 : index
    %54 = vector.load %arg9[%c0_23, %c0_24] : memref<1x300xf32, #tpu.memory_space<vmem>>, vector<1x300xf32>
    %55 = vector.broadcast %54 : vector<1x300xf32> to vector<8x300xf32>
    %56 = arith.addf %53, %55 : vector<8x300xf32>
    %cst_25 = arith.constant 0.000000e+00 : f32
    %57 = vector.broadcast %cst_25 : f32 to vector<8x300xf32>
    %58 = arith.maximumf %56, %57 : vector<8x300xf32>
    %c0_26 = arith.constant 0 : index
    %c0_27 = arith.constant 0 : index
    %59 = vector.load %arg10[%c0_26, %c0_27] : memref<1x300xf32, #tpu.memory_space<vmem>>, vector<1x300xf32>
    %60 = vector.broadcast %59 : vector<1x300xf32> to vector<8x300xf32>
    %61 = arith.mulf %58, %60 : vector<8x300xf32>
    %cst_28 = arith.constant dense<0.000000e+00> : vector<8xf32>
    %62 = vector.multi_reduction <add>, %61, %cst_28 [1] : vector<8x300xf32> to vector<8xf32>
    %63 = vector.shape_cast %62 : vector<8xf32> to vector<8x1xf32>
    %c0_29 = arith.constant 0 : index
    %c0_30 = arith.constant 0 : index
    %64 = memref.load %arg11[%c0_29, %c0_30] : memref<1x1xf32, #tpu.memory_space<smem>>
    %65 = vector.broadcast %64 : f32 to vector<8x1xf32>
    %66 = arith.addf %63, %65 : vector<8x1xf32>
    %c0_31 = arith.constant 0 : index
    %c0_32 = arith.constant 0 : index
    %67 = vector.load %arg12[%c0_31, %c0_32] : memref<8x1xf32, #tpu.memory_space<vmem>>, vector<8x1xf32>
    tpu.vector_store %arg12[%c0_31, %c0_32], %66 {strides = array<i32>} : memref<8x1xf32, #tpu.memory_space<vmem>>, vector<8x1xf32>,
    return
  }
  func.func @transform_0(%arg0: i32) -> (i32, i32) {
    %c0_i32 = arith.constant 0 : i32
    %c0_i32_0 = arith.constant 0 : i32
    return %arg0, %c0_i32 : i32, i32
  }
  func.func @transform_1(%arg0: i32) -> (i32, i32) {
    %c0_i32 = arith.constant 0 : i32
    %c0_i32_0 = arith.constant 0 : i32
    return %arg0, %c0_i32 : i32, i32
  }
  func.func @transform_2(%arg0: i32) -> (i32, i32) {
    %c0_i32 = arith.constant 0 : i32
    %c0_i32_0 = arith.constant 0 : i32
    %c0_i32_1 = arith.constant 0 : i32
    return %c0_i32, %c0_i32_0 : i32, i32
  }
  func.func @transform_3(%arg0: i32) -> (i32, i32) {
    %c0_i32 = arith.constant 0 : i32
    %c0_i32_0 = arith.constant 0 : i32
    %c0_i32_1 = arith.constant 0 : i32
    return %c0_i32, %c0_i32_0 : i32, i32
  }
  func.func @transform_4(%arg0: i32) -> (i32, i32) {
    %c0_i32 = arith.constant 0 : i32
    %c0_i32_0 = arith.constant 0 : i32
    %c0_i32_1 = arith.constant 0 : i32
    return %c0_i32, %c0_i32_0 : i32, i32
  }
  func.func @transform_5(%arg0: i32) -> (i32, i32) {
    %c0_i32 = arith.constant 0 : i32
    %c0_i32_0 = arith.constant 0 : i32
    %c0_i32_1 = arith.constant 0 : i32
    return %c0_i32, %c0_i32_0 : i32, i32
  }
  func.func @transform_6(%arg0: i32) -> (i32, i32) {
    %c0_i32 = arith.constant 0 : i32
    %c0_i32_0 = arith.constant 0 : i32
    %c0_i32_1 = arith.constant 0 : i32
    return %c0_i32, %c0_i32_0 : i32, i32
  }
  func.func @transform_7(%arg0: i32) -> (i32, i32) {
    %c0_i32 = arith.constant 0 : i32
    %c0_i32_0 = arith.constant 0 : i32
    %c0_i32_1 = arith.constant 0 : i32
    return %c0_i32, %c0_i32_0 : i32, i32
  }
  func.func @transform_8(%arg0: i32) -> (i32, i32) {
    %c0_i32 = arith.constant 0 : i32
    %c0_i32_0 = arith.constant 0 : i32
    %c0_i32_1 = arith.constant 0 : i32
    return %c0_i32, %c0_i32_0 : i32, i32
  }
  func.func @transform_9(%arg0: i32) -> (i32, i32) {
    %c0_i32 = arith.constant 0 : i32
    %c0_i32_0 = arith.constant 0 : i32
    %c0_i32_1 = arith.constant 0 : i32
    return %c0_i32, %c0_i32_0 : i32, i32
  }
  func.func @transform_10(%arg0: i32) -> (i32, i32) {
    %c0_i32 = arith.constant 0 : i32
    %c0_i32_0 = arith.constant 0 : i32
    %c0_i32_1 = arith.constant 0 : i32
    return %c0_i32, %c0_i32_0 : i32, i32
  }
  func.func @transform_11(%arg0: i32) -> (i32, i32) {
    %c0_i32 = arith.constant 0 : i32
    %c0_i32_0 = arith.constant 0 : i32
    return %arg0, %c0_i32 : i32, i32
  }
}

</mosaic_0001>

<bundles_post_ra>
// kernel: tpu_custom_call.1
= control target key start
LH: loop header
LB: loop body
LE: loop exit
PB: predicated region body
PF: predicated region fallthrough
CT: control target
= control target key end

     0   :  { %17 = vsyncpa [#allocation4], 0  ;;  %s1260_s17 = smov [#allocation3]   ;;  %s1486_s0 = inlined_call_operand.vmem [shape: f32[8,3], index: 0, kind: input, shape index: {}]   ;;  %s1487_s1 = inlined_call_operand.vmem [shape: f32[8,1], index: 1, kind: input, shape index: {}]   ;;  %s1488_s2 = inlined_call_operand.vmem [shape: f32[3,400], index: 2, kind: input, shape index: {}]   ;;  %s1489_s3 = inlined_call_operand.vmem [shape: f32[1,400], index: 3, kind: input, shape index: {}]   ;;  %s1490_s4 = inlined_call_operand.vmem [shape: f32[1,400], index: 4, kind: input, shape index: {}]   ;;  %s1491_s5 = inlined_call_operand.vmem [shape: f32[1,400], index: 5, kind: input, shape index: {}]   ;;  %s1492_s6 = inlined_call_operand.hbm [shape: bf16[400,300], index: 6, kind: input, shape index: {}]   ;;  %s1493_s7 = inlined_call_operand.vmem [shape: f32[1,300], index: 7, kind: input, shape index: {}]   ;;  %s1494_s8 = inlined_call_operand.vmem [shape: f32[1,300], index: 8, kind: input, shape index: {}]   ;;  %s1495_s9 = inlined_call_operand.vmem [shape: f32[1,300], index: 9, kind: input, shape index: {}]   ;;  %s1496_s10 = inlined_call_operand.<no memory space> [shape: f32[1,1], index: 10, kind: input, shape index: {}]   ;;  %s1497_s11 = inlined_call_operand.vmem [shape: f32[8,1], index: 11, kind: output, shape index: {}]  }
   0x1   :  { %s35_s18 = sshll.u32 %s1260_s17, 4  ;;  %s1236_s21 = scalar_lea.hbm %s1492_s6, 9600  ;;  %s36_s18 = int_to_ptr.vmem [resolvable:$true] %s35_s18 }
   0x2   :  { %p1237_p0 = scmp.ne.s32.totalorder %s1492_s6, %s1236_s21  ;;  %p1240_p1 = scmp.lt.u32.totalorder %s1236_s21, %s1492_s6 }
   0x4   :  { %p1242_p2 = pnand %p1240_p1, %p1237_p0 }
   0x6   :  { %1245 = shalt.err (!%p1242_p2)
}
   0x7   :  { %s1246_s26 = scalar_lea.vmem %s36_s18, 9600  ;;  %p1251_p4 = scmp.lt.s32.totalorder %s36_s18, %s36_s18 }
   0x8   :  { %p1247_p3 = scmp.ne.s32.totalorder %s36_s18, %s1246_s26  ;;  %p1252_p5 = scmp.lt.s32.totalorder %s1246_s26, %s1246_s26 }
   0xa   :  { %p1253_p6 = por %p1252_p5, %p1251_p4 }
   0xc   :  { %p1254_p7 = pnand %p1253_p6, %p1247_p3 }
   0xe   :  { %1257 = shalt.err (!%p1254_p7)
}
   0xf   :  { %s1261_s27 = smov 192   ;;  %s1262_s28 = smov 12  }
  0x10   :  { %41 = dma.hbm_to_vmem [thread:$0]  %s1492_s6, 9600, %s36_s18, [#allocation4], %s1261_s27, %s1261_s27, %s1262_s28  }
  0x11   :  { %1258 = dma.done.wait [#allocation4], 9600  }
  0x12   :  { %1259 = vsyncadd [#allocation4], 4294957696  ;;  %v1263_v0 = vmov 0   ;;  %v1264_v1 = vmov 2   ;;  %v54_v2 = vld [vmem:[%s1486_s0] sm:$0xff]  ;;  %v1265_v3 = vmov 1   ;;  %v63_v4 = vlaneseq }
  0x13   :  { %1129 = vset.pattern.permute.xlu0 %v1263_v0  ;;  %1131 = vset.pattern.permute.xlu1 %v1264_v1  ;;  %v56_v10 = vld [vmem:[%s1488_s2] ss:$4 sm:$0xf]  ;;  %v1023_v11 = vld [vmem:[%s1488_s2 + $0x2] ss:$4 sm:$0xf] }
  0x14   :  { %59 = vperm.xlu0 %1129, %v54_v2   ;;  %125 = vperm.xlu1 %1131, %v54_v2   ;;  %v64_v5 = vshrl.u32 %v63_v4, 7  ;;  %v1022_v12 = vld [vmem:[%s1488_s2 + $0x1] ss:$4 sm:$0xf]  ;;  %vm189_vm0 = vcmask 130048   ;;  %vm1007_vm1 = vcmask 359424  }
  0x15   :  { %v157_v31 = vld [vmem:[%s1489_s3] sm:$0xf]  ;;  %v1137_v4 = vld [vmem:[#allocation3 + $0x1c] ss:$12 sps:$4 sm:$0xff]   ;;  %vm1015_vm2 = vcmask 7168  }
  0x16   :  { %v1344_v6 = vsub.s32 0, %v64_v5  ;;  %v1346_v7 = vsub.s32 1, %v64_v5  ;;  %v1348_v8 = vsub.s32 2, %v64_v5  ;;  %v1350_v9 = vsub.s32 3, %v64_v5  ;;  %v1139_v5 = vld [vmem:[#allocation3 + $0x18] ss:$12 sps:$4 sm:$0xff]  }
  0x18   :  { %1130 = vset.pattern.permute.xlu0 %v1265_v3  ;;  %1132 = vset.pattern.permute.xlu1 %v1263_v0  ;;  %v66_v13 = vrot.slane %v56_v10, %v1344_v6  ;;  %v70_v14 = vrot.slane %v56_v10, %v1346_v7  ;;  %v74_v15 = vrot.slane %v56_v10, %v1348_v8  ;;  %v1136_v3 = vld [vmem:[#allocation3] ss:$12 sps:$4 sm:$0xff]  }
  0x19   :  { %90 = vperm.xlu0 %1130, %v54_v2   ;;  %v78_v16 = vrot.slane %v56_v10, %v1350_v9  ;;  %v132_v18 = vrot.slane %v1023_v11, %v1344_v6  ;;  %v136_v19 = vrot.slane %v1023_v11, %v1346_v7  ;;  %v140_v20 = vrot.slane %v1023_v11, %v1348_v8  ;;  %v1134_v2 = vld [vmem:[#allocation3 + $0x4] ss:$12 sps:$4 sm:$0xff]   ;;  %v1140_v10 = vld [vmem:[#allocation3 + $0x34] ss:$12 sps:$4 sm:$0xff]  }
  0x1a   :  { %v144_v21 = vrot.slane %v1023_v11, %v1350_v9  ;;  %v97_v22 = vrot.slane %v1022_v12, %v1344_v6  ;;  %v101_v23 = vrot.slane %v1022_v12, %v1346_v7  ;;  %v105_v24 = vrot.slane %v1022_v12, %v1348_v8  ;;  %801 = vmatprep.subr.bf16.mxu0 %v1134_v2  ;;  %v1157_v11 = vld [vmem:[#allocation3 + $0x184] ss:$12 sps:$4 sm:$0xff]   ;;  %v1202_v2 = vld [vmem:[#allocation3 + $0x228] ss:$12 sps:$4 sm:$0xff]  }
  0x1b   :  { %v109_v25 = vrot.slane %v1022_v12, %v1350_v9  ;;  %v162_v41 = vrot.slane %v157_v31, %v1344_v6  ;;  %v166_v42 = vrot.slane %v157_v31, %v1346_v7  ;;  %v170_v43 = vrot.slane %v157_v31, %v1348_v8  ;;  %802 = vmatpush1.bf16.msra.mxu0 %v1136_v3  ;;  %v1160_v12 = vld [vmem:[#allocation3 + $0x180] ss:$12 sps:$4 sm:$0xff]  }
  0x1c   :  { %v174_v44 = vrot.slane %v157_v31, %v1350_v9  ;;  %803 = vmatprep.subr.bf16.mxu0 %v1137_v4  ;;  %842 = vmatprep.subr.bf16.mxu1 %v1157_v11  ;;  %v1167_v31 = vld [vmem:[#allocation3 + $0xdc] ss:$12 sps:$4 sm:$0xff]   ;;  %v1203_v3 = vld [vmem:[#allocation3 + $0x16c] ss:$12 sps:$4 sm:$0xff]   ;;  %v1205_v4 = vld [vmem:[#allocation3 + $0x244] ss:$12 sps:$4 sm:$0xff]  }
  0x1d   :  { %1133 = vset.pattern.permute.xlu0 %v1263_v0  ;;  %843 = vmatpush1.bf16.msra.mxu1 %v1160_v12  ;;  %v1209_v11 = vld [vmem:[#allocation3 + $0xc8] ss:$12 sps:$4 sm:$0xff]   ;;  %v55_v12 = vld [vmem:[%s1487_s1] sm:$0xff] }
  0x1f   :  { %804 = vmatpush1.bf16.msra.mxu0 %v1139_v5  ;;  %v1207_v5 = vld [vmem:[#allocation3 + $0x168] ss:$12 sps:$4 sm:$0xff]  }
  0x20   :  { %805 = vmatprep.subr.bf16.mxu0 %v1140_v10  ;;  %v1208_v10 = vld [vmem:[#allocation3 + $0x240] ss:$12 sps:$4 sm:$0xff]  }
  0x93   :  { %v60_v17 = vpop.permute.xlu0 %59  ;;  %v126_v26 = vpop.permute.xlu1 %125 }
  0x94   :  { %v83_v27 = vmul.f32 %v66_v13, %v60_v17  ;;  %v84_v28 = vmul.f32 %v70_v14, %v60_v17  ;;  %v85_v29 = vmul.f32 %v74_v15, %v60_v17  ;;  %v86_v30 = vmul.f32 %v78_v16, %v60_v17  ;;  %v1163_v13 = vld [vmem:[#allocation3 + $0x19c] ss:$12 sps:$4 sm:$0xff]   ;;  %v1143_v15 = vld [vmem:[#allocation3 + $0x4c] ss:$12 sps:$4 sm:$0xff]   ;;  %v1169_v17 = vld [vmem:[#allocation3 + $0x1b4] ss:$12 sps:$4 sm:$0xff]  }
  0x95   :  { %v149_v33 = vmul.f32 %v132_v18, %v126_v26  ;;  %v150_v34 = vmul.f32 %v136_v19, %v126_v26  ;;  %v151_v35 = vmul.f32 %v140_v20, %v126_v26  ;;  %v152_v36 = vmul.f32 %v144_v21, %v126_v26  ;;  %v1142_v14 = vld [vmem:[#allocation3 + $0x30] ss:$12 sps:$4 sm:$0xff]   ;;  %v1166_v16 = vld [vmem:[#allocation3 + $0x198] ss:$12 sps:$4 sm:$0xff]   ;;  %844 = vmatprep.subr.bf16.mxu1 %v1163_v13  ;;  %v1145_v18 = vld [vmem:[#allocation3 + $0x48] ss:$12 sps:$4 sm:$0xff]  }
  0x96   :  { %806 = vmatpush1.bf16.msra.mxu0 %v1142_v14  ;;  %v1146_v19 = vld [vmem:[#allocation3 + $0x64] ss:$12 sps:$4 sm:$0xff]   ;;  %845 = vmatpush1.bf16.msra.mxu1 %v1166_v16  ;;  %v1175_v21 = vld [vmem:[#allocation3 + $0x1cc] ss:$12 sps:$4 sm:$0xff]   ;;  %v217_v16 = vld [vmem:[%s1490_s4] sm:$0xf] }
  0x97   :  { %807 = vmatprep.subr.bf16.mxu0 %v1143_v15  ;;  %v1172_v20 = vld [vmem:[#allocation3 + $0x1b0] ss:$12 sps:$4 sm:$0xff]   ;;  %846 = vmatprep.subr.bf16.mxu1 %v1169_v17  ;;  %v243_v17 = vld [vmem:[%s1491_s5] sm:$0xf] }
  0x98   :  { %v91_v32 = vpop.permute.xlu0 %90  ;;  %v1154_v26 = vld [vmem:[#allocation3 + $0x90] ss:$12 sps:$4 sm:$0xff]  }
  0x99   :  { %v114_v37 = vmul.f32 %v97_v22, %v91_v32  ;;  %v115_v38 = vmul.f32 %v101_v23, %v91_v32  ;;  %v116_v39 = vmul.f32 %v105_v24, %v91_v32  ;;  %v117_v40 = vmul.f32 %v109_v25, %v91_v32  ;;  %v1148_v22 = vld [vmem:[#allocation3 + $0x60] ss:$12 sps:$4 sm:$0xff]   ;;  %v1149_v23 = vld [vmem:[#allocation3 + $0x7c] ss:$12 sps:$4 sm:$0xff]   ;;  %v1151_v24 = vld [vmem:[#allocation3 + $0x78] ss:$12 sps:$4 sm:$0xff]  }
  0x9a   :  { %808 = vmatpush1.bf16.msra.mxu0 %v1145_v18  ;;  %847 = vmatpush1.bf16.msra.mxu1 %v1172_v20  ;;  %v1152_v25 = vld [vmem:[#allocation3 + $0x94] ss:$12 sps:$4 sm:$0xff]   ;;  %v1171_v32 = vld [vmem:[#allocation3 + $0xd8] ss:$12 sps:$4 sm:$0xff]   ;;  %v226_v18 = vrot.slane %v217_v16, %v1346_v7  ;;  %v222_v20 = vrot.slane %v217_v16, %v1344_v6 }
  0x9b   :  { %v118_v45 = vadd.f32 %v114_v37, %v83_v27  ;;  %v119_v46 = vadd.f32 %v115_v38, %v84_v28  ;;  %v120_v47 = vadd.f32 %v116_v39, %v85_v29  ;;  %v121_v48 = vadd.f32 %v117_v40, %v86_v30  ;;  %809 = vmatprep.subr.bf16.mxu0 %v1146_v19  ;;  %v1155_v27 = vld [vmem:[#allocation3 + $0xac] ss:$12 sps:$4 sm:$0xff]   ;;  %v1159_v28 = vld [vmem:[#allocation3 + $0xa8] ss:$12 sps:$4 sm:$0xff]   ;;  %v1161_v29 = vld [vmem:[#allocation3 + $0xc4] ss:$12 sps:$4 sm:$0xff]  }
  0x9c   :  { %848 = vmatprep.subr.bf16.mxu1 %v1175_v21  ;;  %v1165_v30 = vld [vmem:[#allocation3 + $0xc0] ss:$12 sps:$4 sm:$0xff]   ;;  %v234_v19 = vrot.slane %v217_v16, %v1350_v9  ;;  %v230_v21 = vrot.slane %v217_v16, %v1348_v8 }
  0x9d   :  { %v153_v49 = vadd.f32 %v149_v33, %v118_v45  ;;  %v154_v50 = vadd.f32 %v150_v34, %v119_v46  ;;  %v155_v51 = vadd.f32 %v151_v35, %v120_v47  ;;  %v156_v52 = vadd.f32 %v152_v36, %v121_v48  ;;  %v1173_v33 = vld [vmem:[#allocation3 + $0xf4] ss:$12 sps:$4 sm:$0xff]   ;;  %v1177_v48 = vld [vmem:[#allocation3 + $0xf0] ss:$12 sps:$4 sm:$0xff]  }
  0x9e   :  { %810 = vmatpush1.bf16.msra.mxu0 %v1148_v22 }
  0x9f   :  { %v1380_v53 = vadd.f32 %v162_v41, %v153_v49  ;;  %v1382_v54 = vadd.f32 %v166_v42, %v154_v50  ;;  %v1384_v55 = vadd.f32 %v170_v43, %v155_v51  ;;  %v1386_v56 = vadd.f32 %v174_v44, %v156_v52  ;;  %811 = vmatprep.subr.bf16.mxu0 %v1149_v23  ;;  %v1178_v49 = vld [vmem:[#allocation3 + $0x1c8] ss:$12 sps:$4 sm:$0xff]   ;;  %v1179_v50 = vld [vmem:[#allocation3 + $0x10c] ss:$12 sps:$4 sm:$0xff]   ;;  %v1181_v51 = vld [vmem:[#allocation3 + $0x1e4] ss:$12 sps:$4 sm:$0xff]  }
  0xa0   :  { %849 = vmatpush1.bf16.msra.mxu1 %v1178_v49  ;;  %v1183_v52 = vld [vmem:[#allocation3 + $0x108] ss:$12 sps:$4 sm:$0xff]   ;;  %v252_v23 = vrot.slane %v243_v17, %v1346_v7  ;;  %v1217_v49 = vld [vmem:[#allocation3 + $0x1b8] ss:$12 sps:$4 sm:$0xff]  }
  0xa1   :  { %v183_v57 = vmax.f32 %v1380_v53, 0.0  ;;  %v184_v58 = vmax.f32 %v1382_v54, 0.0  ;;  %v186_v59 = vmax.f32 %v1386_v56, 0.0  ;;  %v185_v60 = vmax.f32 %v1384_v55, 0.0  ;;  %v1184_v53 = vld [vmem:[#allocation3 + $0x1e0] ss:$12 sps:$4 sm:$0xff]   ;;  %850 = vmatprep.subr.bf16.mxu1 %v1181_v51 }
  0xa2   :  { %812 = vmatpush1.bf16.msra.mxu0 %v1151_v24  ;;  %v1185_v54 = vld [vmem:[#allocation3 + $0x124] ss:$12 sps:$4 sm:$0xff]   ;;  %v1187_v55 = vld [vmem:[#allocation3 + $0x1fc] ss:$12 sps:$4 sm:$0xff]   ;;  %v1189_v56 = vld [vmem:[#allocation3 + $0x120] ss:$12 sps:$4 sm:$0xff]   ;;  %v260_v24 = vrot.slane %v243_v17, %v1350_v9 }
  0xa3   :  { %v187_v61 = vadd.f32 %v184_v58, %v183_v57  ;;  %v190_v63 = vsel %vm189_vm0, %v186_v59, 0.0  ;;  %813 = vmatprep.subr.bf16.mxu0 %v1152_v25  ;;  %v248_v25 = vrot.slane %v243_v17, %v1344_v6  ;;  %v1219_v51 = vld [vmem:[#allocation3 + $0x50] ss:$12 sps:$4 sm:$0xff]  }
  0xa4   :  { %851 = vmatpush1.bf16.msra.mxu1 %v1184_v53  ;;  %v1221_v53 = vld [vmem:[#allocation3 + $0x128] ss:$12 sps:$4 sm:$0xff]  }
  0xa5   :  { %v188_v62 = vadd.f32 %v187_v61, %v185_v60  ;;  %852 = vmatprep.subr.bf16.mxu1 %v1187_v55  ;;  %v1196_v61 = vld [vmem:[#allocation3 + $0x210] ss:$12 sps:$4 sm:$0xff]   ;;  %v1223_v55 = vld [vmem:[#allocation3 + $0x1e8] ss:$12 sps:$4 sm:$0xff]  }
  0xa6   :  { %814 = vmatpush1.bf16.msra.mxu0 %v1154_v26  ;;  %v256_v26 = vrot.slane %v243_v17, %v1348_v8 }
  0xa7   :  { %v191_v1 = vadd.f32 %v190_v63, %v188_v62  ;;  %815 = vmatprep.subr.bf16.mxu0 %v1155_v27  ;;  %v1197_v62 = vld [vmem:[#allocation3 + $0x154] ss:$12 sps:$4 sm:$0xff]   ;;  %v1199_v63 = vld [vmem:[#allocation3 + $0x22c] ss:$12 sps:$4 sm:$0xff]  }
  0xa9   :  { %192 = vadd.xlane.f32.xlu1 %v191_v1  ;;  %v1201_v1 = vld [vmem:[#allocation3 + $0x150] ss:$12 sps:$4 sm:$0xff]  }
  0xaa   :  { %816 = vmatpush1.bf16.msra.mxu0 %v1159_v28 }
  0xab   :  { %817 = vmatprep.subr.bf16.mxu0 %v1161_v29 }
  0xae   :  { %818 = vmatpush1.bf16.msra.mxu0 %v1165_v30 }
  0xaf   :  { %819 = vmatprep.subr.bf16.mxu0 %v1167_v31 }
  0xb2   :  { %820 = vmatpush1.bf16.msra.mxu0 %v1171_v32 }
  0xb3   :  { %821 = vmatprep.subr.bf16.mxu0 %v1173_v33 }
  0xb6   :  { %822 = vmatpush1.bf16.msra.mxu0 %v1177_v48  ;;  %v1216_v48 = vld [vmem:[#allocation3 + $0x38] ss:$12 sps:$4 sm:$0xff]  }
  0xb7   :  { %823 = vmatprep.subr.bf16.mxu0 %v1179_v50  ;;  %v1218_v50 = vld [vmem:[#allocation3 + $0x110] ss:$12 sps:$4 sm:$0xff]  }
  0xba   :  { %824 = vmatpush1.bf16.msra.mxu0 %v1183_v52  ;;  %376 = vperm.xlu1 %1132, %v55_v12   ;;  %v1220_v52 = vld [vmem:[#allocation3 + $0x1d0] ss:$12 sps:$4 sm:$0xff]  }
  0xbb   :  { %825 = vmatprep.subr.bf16.mxu0 %v1185_v54  ;;  %v1222_v54 = vld [vmem:[#allocation3 + $0x68] ss:$12 sps:$4 sm:$0xff]  }
  0xbe   :  { %826 = vmatpush1.bf16.msra.mxu0 %v1189_v56  ;;  %v1224_v56 = vld [vmem:[#allocation3 + $0x140] ss:$12 sps:$4 sm:$0xff]  }
 0x136   :  { %v193_v34 = vpop.xlane.xlu1 %192 }
 0x137   :  { %v195_v35 = vmul.f32 0.0025, %v193_v34 }
 0x139   :  { %v1403_v36 = vsub.f32 %v183_v57, %v195_v35  ;;  %v1407_v37 = vsub.f32 %v184_v58, %v195_v35  ;;  %v1411_v38 = vsub.f32 %v185_v60, %v195_v35  ;;  %v1415_v39 = vsub.f32 %v186_v59, %v195_v35  ;;  %v1190_v57 = vld [vmem:[#allocation3 + $0x1f8] ss:$12 sps:$4 sm:$0xff]   ;;  %v1191_v58 = vld [vmem:[#allocation3 + $0x13c] ss:$12 sps:$4 sm:$0xff]   ;;  %v1193_v59 = vld [vmem:[#allocation3 + $0x214] ss:$12 sps:$4 sm:$0xff]  }
 0x13a   :  { %853 = vmatpush1.bf16.msra.mxu1 %v1190_v57  ;;  %v1195_v60 = vld [vmem:[#allocation3 + $0x138] ss:$12 sps:$4 sm:$0xff]   ;;  %827 = vmatprep.subr.bf16.mxu0 %v1191_v58  ;;  %v1225_v57 = vld [vmem:[#allocation3 + $0x80] ss:$12 sps:$4 sm:$0xff]  }
 0x13b   :  { %v200_v40 = vmul.f32 %v1403_v36, %v1403_v36  ;;  %v201_v41 = vmul.f32 %v1407_v37, %v1407_v37  ;;  %v203_v42 = vmul.f32 %v1415_v39, %v1415_v39  ;;  %v202_v43 = vmul.f32 %v1411_v38, %v1411_v38  ;;  %854 = vmatprep.subr.bf16.mxu1 %v1193_v59  ;;  %v1226_v58 = vld [vmem:[#allocation3 + $0x200] ss:$12 sps:$4 sm:$0xff]   ;;  %v1227_v59 = vld [vmem:[#allocation3 + $0x158] ss:$12 sps:$4 sm:$0xff]  }
 0x13c   :  { %828 = vmatpush1.bf16.msra.mxu0 %v1195_v60  ;;  %v1228_v60 = vld [vmem:[#allocation3 + $0x98] ss:$12 sps:$4 sm:$0xff]  }
 0x13d   :  { %v204_v44 = vadd.f32 %v201_v41, %v200_v40  ;;  %v206_v46 = vsel %vm189_vm0, %v203_v42, 0.0  ;;  %829 = vmatprep.subr.bf16.mxu0 %v1197_v62  ;;  %v1230_v62 = vld [vmem:[#allocation3 + $0x170] ss:$12 sps:$4 sm:$0xff]  }
 0x13e   :  { %855 = vmatpush1.bf16.msra.mxu1 %v1196_v61  ;;  %v1229_v61 = vld [vmem:[#allocation3 + $0x218] ss:$12 sps:$4 sm:$0xff]  }
 0x13f   :  { %v205_v45 = vadd.f32 %v204_v44, %v202_v43  ;;  %856 = vmatprep.subr.bf16.mxu1 %v1199_v63  ;;  %v1231_v63 = vld [vmem:[#allocation3 + $0xb0] ss:$12 sps:$4 sm:$0xff]  }
 0x140   :  { %830 = vmatpush1.bf16.msra.mxu0 %v1201_v1  ;;  %v1232_v1 = vld [vmem:[#allocation3 + $0x230] ss:$12 sps:$4 sm:$0xff]  }
 0x141   :  { %v207_v47 = vadd.f32 %v206_v46, %v205_v45  ;;  %831 = vmatprep.subr.bf16.mxu0 %v1203_v3  ;;  %v1211_v46 = vld [vmem:[#allocation3 + $0x188] ss:$12 sps:$4 sm:$0xff]   ;;  %v373_v3 = vld [vmem:[%s1493_s7] sm:$0x7] }
 0x142   :  { %857 = vmatpush1.bf16.msra.mxu1 %v1202_v2  ;;  %v1233_v2 = vld [vmem:[#allocation3 + $0x248] ss:$12 sps:$4 sm:$0xff]  }
 0x143   :  { %208 = vadd.xlane.f32.xlu0 %v207_v47  ;;  %858 = vmatprep.subr.bf16.mxu1 %v1205_v4  ;;  %v1215_v47 = vld [vmem:[#allocation3 + $0xf8] ss:$12 sps:$4 sm:$0xff]   ;;  %v383_v4 = vrot.slane %v373_v3, %v1344_v6 }
 0x144   :  { %832 = vmatpush1.bf16.msra.mxu0 %v1207_v5  ;;  %v387_v5 = vrot.slane %v373_v3, %v1346_v7 }
 0x145   :  { %923 = vmatprep.subr.bf16.mxu0 %v1263_v0 }
 0x146   :  { %859 = vmatpush1.bf16.msra.mxu1 %v1208_v10  ;;  %v377_v10 = vpop.permute.xlu1 %376 }
 0x147   :  { %1101 = vmatprep.subr.bf16.mxu1 %v1209_v11  ;;  %v395_v11 = vmul.f32 %v383_v4, %v377_v10  ;;  %v396_v12 = vmul.f32 %v387_v5, %v377_v10 }
 0x1d0   :  { %v209_v13 = vpop.xlane.xlu0 %208 }
 0x1d1   :  { %v210_v14 = vmul.f32 0.0025, %v209_v13  ;;  %v963_v13 = vld [vmem:[%s1494_s8] sm:$0x7] }
 0x1d2   :  { %v968_v16 = vrot.slane %v963_v13, %v1344_v6 }
 0x1d3   :  { %v211_v15 = vadd.f32 1e-05, %v210_v14 }
 0x1d5   :  { %1234 = vrsqrt.f32 %v211_v15 }
 0x1df   :  { %v1235_v22 = vpop.eup %1234 }
 0x1e0   :  { %v214_v27 = vmul.f32 %v1235_v22, %v1407_v37  ;;  %v216_v28 = vmul.f32 %v1235_v22, %v1415_v39  ;;  %v213_v29 = vmul.f32 %v1235_v22, %v1403_v36  ;;  %v215_v30 = vmul.f32 %v1235_v22, %v1411_v38  ;;  %v1210_v37 = vld [vmem:[#allocation3 + $0x8] ss:$12 sps:$4 sm:$0xff]   ;;  %v1212_v36 = vld [vmem:[#allocation3 + $0xe0] ss:$12 sps:$4 sm:$0xff]  }
 0x1e1   :  { %v1213_v38 = vld [vmem:[#allocation3 + $0x20] ss:$12 sps:$4 sm:$0xff]  }
 0x1e2   :  { %v240_v31 = vmul.f32 %v226_v18, %v214_v27  ;;  %v242_v32 = vmul.f32 %v234_v19, %v216_v28  ;;  %v239_v33 = vmul.f32 %v222_v20, %v213_v29  ;;  %v241_v34 = vmul.f32 %v230_v21, %v215_v30  ;;  %v1214_v39 = vld [vmem:[#allocation3 + $0x1a0] ss:$12 sps:$4 sm:$0xff]  }
 0x1e3   :  { %v986_v19 = vld [vmem:[%s1495_s9] sm:$0x7]  ;;  %v972_v21 = vrot.slane %v963_v13, %v1346_v7 }
 0x1e4   :  { %v266_v35 = vadd.f32 %v252_v23, %v240_v31  ;;  %v268_v40 = vadd.f32 %v260_v24, %v242_v32  ;;  %v265_v41 = vadd.f32 %v248_v25, %v239_v33  ;;  %v267_v9 = vadd.f32 %v256_v26, %v241_v34 }
 0x1e5   :  { %v991_v29 = vrot.slane %v986_v19, %v1344_v6  ;;  %v995_v31 = vrot.slane %v986_v19, %v1346_v7  ;;  %v976_v6 = vrot.slane %v963_v13, %v1348_v8 }
 0x1e6   :  { %v270_v42 = vpack.c.bf16 %v266_v35, %v266_v35  ;;  %v272_v43 = vpack.c.bf16 %v268_v40, %v268_v40  ;;  %v269_v44 = vpack.c.bf16 %v265_v41, %v265_v41  ;;  %v1448_v45 = vpack.c.bf16 %v267_v9, %v267_v9 }
 0x1e7   :  { %v391_v41 = vrot.slane %v373_v3, %v1348_v8 }
 0x1e8   :  { %833 = vmatprep.mubr.bf16.mxu0 %v270_v42  ;;  %1099 = vmatprep.mubr.msk.bf16.mxu1 %vm189_vm0, %v272_v43 }
 0x1e9   :  { %834 = vmatmul.mubr.bf16.vlgmr.msra.gmra.mrb[0].mxu0 %v269_v44  ;;  %875 = vmatmul.mubr.bf16.vlgmr.msra.gmra.mrb[0].mxu1 %v1448_v45  ;;  %v397_v9 = vmul.f32 %v391_v41, %v377_v10 }
 0x1ea   :  { %1102 = vmatpush3.bf16.msra.mxu1 %v1210_v37  ;;  %924 = vmatpush1.bf16.msra.mxu0 %v1211_v46 }
 0x1eb   :  { %915 = vmatprep.mubr.bf16.mxu1 %v270_v42  ;;  %1100 = vmatprep.mubr.msk.bf16.mxu0 %vm189_vm0, %v272_v43 }
 0x1ec   :  { %1103 = vmatprep.subr.bf16.mxu1 %v1212_v36  ;;  %925 = vmatprep.subr.bf16.mxu0 %v1263_v0 }
 0x1ee   :  { %1104 = vmatpush3.bf16.msra.mxu1 %v1213_v38  ;;  %926 = vmatpush1.bf16.msra.mxu0 %v1214_v39 }
 0x1ef   :  { %1105 = vmatprep.subr.bf16.mxu1 %v1215_v47  ;;  %927 = vmatprep.subr.bf16.mxu0 %v1263_v0 }
 0x1f2   :  { %1106 = vmatpush3.bf16.msra.mxu1 %v1216_v48  ;;  %928 = vmatpush1.bf16.msra.mxu0 %v1217_v49  ;;  %v999_v49 = vrot.slane %v986_v19, %v1348_v8 }
 0x1f3   :  { %1107 = vmatprep.subr.bf16.mxu1 %v1218_v50  ;;  %929 = vmatprep.subr.bf16.mxu0 %v1263_v0 }
 0x1f6   :  { %1108 = vmatpush3.bf16.msra.mxu1 %v1219_v51  ;;  %930 = vmatpush1.bf16.msra.mxu0 %v1220_v52 }
 0x1f7   :  { %1109 = vmatprep.subr.bf16.mxu1 %v1221_v53  ;;  %931 = vmatprep.subr.bf16.mxu0 %v1263_v0 }
 0x1fa   :  { %1110 = vmatpush3.bf16.msra.mxu1 %v1222_v54  ;;  %932 = vmatpush1.bf16.msra.mxu0 %v1223_v55  ;;  %v1013_v54 = vstv %s1496_s10 }
 0x1fb   :  { %1111 = vmatprep.subr.bf16.mxu1 %v1224_v56  ;;  %933 = vmatprep.subr.bf16.mxu0 %v1263_v0 }
 0x1fe   :  { %1112 = vmatpush3.bf16.msra.mxu1 %v1225_v57  ;;  %934 = vmatpush1.bf16.msra.mxu0 %v1226_v58 }
 0x1ff   :  { %1113 = vmatprep.subr.bf16.mxu1 %v1227_v59  ;;  %935 = vmatprep.subr.bf16.mxu0 %v1263_v0 }
 0x202   :  { %1114 = vmatpush3.bf16.msra.mxu1 %v1228_v60  ;;  %936 = vmatpush1.bf16.msra.mxu0 %v1229_v61 }
 0x203   :  { %1115 = vmatprep.subr.bf16.mxu1 %v1230_v62  ;;  %937 = vmatprep.subr.bf16.mxu0 %v1263_v0 }
 0x206   :  { %1116 = vmatpush3.bf16.msra.mxu1 %v1231_v63  ;;  %938 = vmatpush1.bf16.msra.mxu0 %v1232_v1 }
 0x207   :  { %939 = vmatprep.subr.bf16.mxu0 %v1263_v0 }
 0x209   :  { %916 = vmatmul.mubr.bf16.vlgmr.msra.gmra.mrb[4].mxu1 %v269_v44 }
 0x20a   :  { %940 = vmatpush1.bf16.msra.mxu0 %v1233_v2 }
 0x20d   :  { %956 = vmatmul.mubr.bf16.vlgmr.msra.gmra.mrb[4].mxu0 %v1448_v45 }
 0x2bc   :  { %v835_v0 = vpop.f32.mrb[0].mxu0  ;;  %v876_v14 = vpop.f32.mrb[0].mxu1 }
 0x2bd   :  { %v836_v15 = vadd.f32 %v835_v0, %v395_v11  ;;  %v837_v17 = vpop.f32.mrb[1].mxu0  ;;  %v878_v18 = vpop.f32.mrb[1].mxu1 }
 0x2be   :  { %v838_v20 = vadd.f32 %v837_v17, %v396_v12  ;;  %v839_v22 = vpop.f32.mrb[2].mxu0  ;;  %v880_v23 = vpop.f32.mrb[2].mxu1 }
 0x2bf   :  { %v877_v24 = vadd.f32 %v876_v14, %v836_v15  ;;  %v840_v25 = vpop.f32.mrb[3].mxu0  ;;  %v881_v26 = vpop.f32.mrb[3].mxu1 }
 0x2c0   :  { %v879_v27 = vadd.f32 %v878_v18, %v838_v20 }
 0x2c1   :  { %v980_v28 = vadd.f32 %v968_v16, %v877_v24 }
 0x2c2   :  { %v981_v30 = vadd.f32 %v972_v21, %v879_v27 }
 0x2c3   :  { %v983_v32 = vmax.f32 %v980_v28, 0.0 }
 0x2c4   :  { %v984_v33 = vmax.f32 %v981_v30, 0.0 }
 0x2c5   :  { %v1003_v34 = vmul.f32 %v991_v29, %v983_v32 }
 0x2c6   :  { %v1004_v35 = vmul.f32 %v995_v31, %v984_v33 }
 0x2c8   :  { %v1006_v40 = vadd.f32 %v1004_v35, %v1003_v34 }
 0x2dc   :  { %v1117_v42 = vpop.f32.mrb[4].mxu1 }
 0x2dd   :  { %v1118_v43 = vpop.f32.mrb[5].mxu1 }
 0x2de   :  { %v1119_v44 = vadd.f32 %v1118_v43, %v1117_v42  ;;  %v1120_v45 = vpop.f32.mrb[6].mxu1 }
 0x2df   :  { %v1121_v37 = vpop.f32.mrb[7].mxu1 }
 0x2e0   :  { %v918_v46 = vadd.f32 %v1119_v44, %v397_v9  ;;  %v957_v36 = vpop.f32.mrb[4].mxu0 }
 0x2e1   :  { %v959_v38 = vpop.f32.mrb[5].mxu0 }
 0x2e2   :  { %v958_v39 = vadd.f32 %v957_v36, %v918_v46  ;;  %v960_v7 = vpop.f32.mrb[6].mxu0 }
 0x2e3   :  { %v961_v47 = vpop.f32.mrb[7].mxu0 }
 0x2e4   :  { %v982_v48 = vadd.f32 %v976_v6, %v958_v39 }
 0x2e6   :  { %v985_v50 = vmax.f32 %v982_v48, 0.0 }
 0x2e8   :  { %v1005_v51 = vmul.f32 %v999_v49, %v985_v50 }
 0x2ea   :  { %v1008_v52 = vsel %vm1007_vm1, %v1005_v51, 0.0 }
 0x2eb   :  { %v1009_v53 = vadd.f32 %v1008_v52, %v1006_v40 }
 0x2ed   :  { %1010 = vadd.xlane.f32.xlu0 %v1009_v53 }
 0x37a   :  { %v1011_v55 = vpop.xlane.xlu0 %1010 }
 0x37b   :  { %v1014_v56 = vadd.f32 %v1013_v54, %v1011_v55 }
 0x37d   :  { %1016 = vst.msk [vmem:[%s1497_s11] sm:$0xff] %vm1015_vm2, %v1014_v56 }
 0x37e   :  { %1021 = vsyncpa [#allocation4], 1 }

</bundles_post_ra>
